<compile_context>
chip_gen: v7x
topology: tpu7x:2x2x1
jax: 0.10.0
libtpu: 0.0.40
codegen_flags: <defaults>
</compile_context>

<pallas_src>
import jax
import jax.numpy as jnp
from jax.experimental import pallas as pl
from jax.experimental.pallas import tpu as pltpu


def _round_up(x, m):
    return ((x + m - 1) // m) * m


def _cdiv(a, b):
    return -(-a // b)


def patch_embed_kernel(x_ref, w_ref, b_ref, o_ref):
    # x_ref: (tm, K) patch tile; w_ref: (K, tn) resident weight slab;
    # b_ref: (1, tn) f32 bias; o_ref: (tm, tn).
    acc = jnp.dot(x_ref[...], w_ref[...], preferred_element_type=jnp.float32)
    o_ref[...] = (acc + b_ref[...]).astype(o_ref.dtype)


def image_embed(
    x,
    weight,
    bias,
    patch_dim,
    *,
    compute_dtype=jnp.bfloat16,
    out_dtype=None,
    tm=1024,
    vmem_budget_bytes=12 * 1024 * 1024,
    vmem_limit_bytes=None,
):
    """x: (B, C, H, W) NCHW; weight: (E, C, p, p); bias: (E,).

    Returns (B, n_patches, E), matching
    proj(x).flatten(2).transpose(1, 2) from the PyTorch module.
    """
    B, C, H, W = x.shape
    E = weight.shape[0]
    p = patch_dim
    Hg, Wg = H // p, W // p
    n_patches = Hg * Wg
    K = C * p * p
    M = B * n_patches

    odtype = x.dtype if out_dtype is None else out_dtype
    cdtype = compute_dtype if compute_dtype is not None else x.dtype
    csize = jnp.dtype(cdtype).itemsize
    osize = jnp.dtype(odtype).itemsize
    sub = {4: 8, 2: 16, 1: 32}.get(csize, 8)  # sublane packing per dtype

    # Patch extraction: ONE fused XLA transpose+cast (no jnp.pad, no second
    # copy).  Row-major (gh, gw) matches flatten(2) on the conv output; the
    # per-patch (c, i, j) order matches the Conv2d weight flattening.
    patches = (
        x.reshape(B, C, Hg, p, Wg, p)
        .transpose(0, 2, 4, 1, 3, 5)
        .astype(cdtype)
        .reshape(M, K)
    )
    w_mat = weight.reshape(E, K).T.astype(cdtype)   # (K, E)
    b_row = bias.reshape(1, E).astype(jnp.float32)  # (1, E)

    # --- tile selection (no padding anywhere) ---------------------------
    # LHS block is (tm, K) with K full; weight block is (K, tn) with K full;
    # full-dim block dims are exempt from the (8, 128) rule.
    tm_ = tm if M >= tm else M          # full-M block is always legal
    tn_ = E                             # weight fully VMEM-resident (common)

    def working_set(tm_b, tn_b):
        # conservative: everything counted double-buffered
        return 2 * (tm_b * K * csize + K * tn_b * csize + tn_b * 4
                    + tm_b * tn_b * osize)

    # Shrink tm first (keeps the weight resident), then tile E if needed.
    while working_set(tm_, tn_) > vmem_budget_bytes and tm_ > 4 * sub:
        tm_ = max(4 * sub, _round_up(tm_ // 2, sub))
    while working_set(tm_, tn_) > vmem_budget_bytes and tn_ > 128:
        tn_ = max(128, _round_up(tn_ // 2, 128))

    n_m = _cdiv(M, tm_)
    n_e = _cdiv(E, tn_)
    grid = (n_e, n_m)  # E outer, M inner: weight/bias block index constant
                       # across the inner sweep -> DMA'd once per E tile.

    cost = pl.CostEstimate(
        flops=2 * M * K * E,
        transcendentals=0,
        bytes_accessed=(n_e * M * K * csize + K * E * csize + E * 4
                        + M * E * osize),
    )

    out = pl.pallas_call(
        patch_embed_kernel,
        out_shape=jax.ShapeDtypeStruct((M, E), odtype),
        grid=grid,
        in_specs=[
            pl.BlockSpec((tm_, K), lambda j, i: (i, 0)),   # patches tile
            pl.BlockSpec((K, tn_), lambda j, i: (0, j)),   # resident weight
            pl.BlockSpec((1, tn_), lambda j, i: (0, j)),   # resident bias
        ],
        out_specs=pl.BlockSpec((tm_, tn_), lambda j, i: (i, j)),
        compiler_params=pltpu.CompilerParams(
            dimension_semantics=("parallel", "parallel"),
            vmem_limit_bytes=vmem_limit_bytes,
        ),
        cost_estimate=cost,
    )(patches, w_mat, b_row)

    # Free reshape (contiguous split), no slicing needed (nothing was padded).
    return out.reshape(B, n_patches, E)


def reference_image_embed(x, weight, bias, patch_dim):
    """Pure-JAX reference: stride-p conv == patch extract + matmul."""
    B, C, H, W = x.shape
    E = weight.shape[0]
    p = patch_dim
    Hg, Wg = H // p, W // p
    patches = (
        x.reshape(B, C, Hg, p, Wg, p)
        .transpose(0, 2, 4, 1, 3, 5)
        .reshape(B, Hg * Wg, C * p * p)
    )
    return (
        jnp.einsum("bnk,ek->bne", patches, weight.reshape(E, -1))
        + bias[None, None, :]
    )


if __name__ == "__main__":
    # Small shapes consistent with the module:
    # img_dim=16, patch_dim=4, in_channels=4, embed_dim=32 -> n_patches=16
    B, C, img_dim, patch_dim, embed_dim = 2, 4, 16, 4, 32

    key = jax.random.PRNGKey(0)
    kx, kw, kb = jax.random.split(key, 3)

    x = jax.random.normal(kx, (B, C, img_dim, img_dim), dtype=jnp.float32)

    # Deterministic synthetic parameters (Conv2d shapes: (E, C, p, p), (E,)).
    fan_in = C * patch_dim * patch_dim
    bound = 1.0 / (fan_in ** 0.5)
    weight = jax.random.uniform(
        kw, (embed_dim, C, patch_dim, patch_dim), jnp.float32, -bound, bound
    )
    bias = jax.random.uniform(kb, (embed_dim,), jnp.float32, -bound, bound)

    ref = reference_image_embed(x, weight, bias, patch_dim)
    n_patches = (img_dim // patch_dim) ** 2

    # f32 compute path: exact (up to accumulation order) vs reference.
    out_f32 = jax.block_until_ready(
        image_embed(x, weight, bias, patch_dim, compute_dtype=jnp.float32)
    )
    assert out_f32.shape == (B, n_patches, embed_dim)
    assert jnp.allclose(out_f32, ref, atol=1e-5, rtol=1e-5)

    # Default path: bf16 compute (f32 accumulation), f32 output.
    out_def = jax.block_until_ready(image_embed(x, weight, bias, patch_dim))
    assert out_def.shape == (B, n_patches, embed_dim)
    assert out_def.dtype == x.dtype
    assert jnp.allclose(out_def, ref, atol=5e-2, rtol=5e-2)

    # bf16 output path (halves the output write bytes).
    out_bf16 = jax.block_until_ready(
        image_embed(x, weight, bias, patch_dim, out_dtype=jnp.bfloat16)
    )
    assert out_bf16.dtype == jnp.bfloat16
    assert jnp.allclose(out_bf16.astype(jnp.float32), ref, atol=1e-1, rtol=1e-1)

    print("KERNEL_OK")
</pallas_src>

<mosaic_0001>
module attributes {stable_mosaic.version = 11 : i64} {
  func.func @patch_embed_kernel(%arg0: i32, %arg1: i32, %arg2: memref<32x64xf32, #tpu.memory_space<vmem>>, %arg3: memref<64x32xf32, #tpu.memory_space<vmem>>, %arg4: memref<1x32xf32, #tpu.memory_space<vmem>>, %arg5: memref<32x32xf32, #tpu.memory_space<vmem>>) attributes {dimension_semantics = [#tpu.dimension_semantics<parallel>, #tpu.dimension_semantics<parallel>], iteration_bounds = array<i64: 1, 1>, scalar_prefetch = 0 : i64, scratch_operands = 0 : i64, tpu.core_type = #tpu.core_type<tc>, window_params = [{transform_indices = @transform_0, window_bounds = array<i64: 32, 64>}, {transform_indices = @transform_1, window_bounds = array<i64: 64, 32>}, {transform_indices = @transform_2, window_bounds = array<i64: 1, 32>}, {transform_indices = @transform_3, window_bounds = array<i64: 32, 32>}]} {
    %c0 = arith.constant 0 : index
    %c0_0 = arith.constant 0 : index
    %0 = vector.load %arg2[%c0, %c0_0] : memref<32x64xf32, #tpu.memory_space<vmem>>, vector<32x64xf32>
    %c0_1 = arith.constant 0 : index
    %c0_2 = arith.constant 0 : index
    %1 = vector.load %arg3[%c0_1, %c0_2] : memref<64x32xf32, #tpu.memory_space<vmem>>, vector<64x32xf32>
    %cst = arith.constant dense<0.000000e+00> : vector<32x32xf32>
    %2 = tpu.matmul %0, %1, %cst {dimension_numbers = #tpu.dot_dimension_numbers<[1], [0], [0], [1], [0, 0, 1, 1], [], []>} : vector<32x64xf32>, vector<64x32xf32>, vector<32x32xf32> -> vector<32x32xf32>
    %c0_3 = arith.constant 0 : index
    %c0_4 = arith.constant 0 : index
    %3 = vector.load %arg4[%c0_3, %c0_4] : memref<1x32xf32, #tpu.memory_space<vmem>>, vector<1x32xf32>
    %4 = vector.broadcast %3 : vector<1x32xf32> to vector<32x32xf32>
    %5 = arith.addf %2, %4 : vector<32x32xf32>
    %c0_5 = arith.constant 0 : index
    %c0_6 = arith.constant 0 : index
    %6 = vector.load %arg5[%c0_5, %c0_6] : memref<32x32xf32, #tpu.memory_space<vmem>>, vector<32x32xf32>
    tpu.vector_store %arg5[%c0_5, %c0_6], %5 {strides = array<i32>} : memref<32x32xf32, #tpu.memory_space<vmem>>, vector<32x32xf32>,
    return
  }
  func.func @transform_0(%arg0: i32, %arg1: i32) -> (i32, i32) {
    %c0_i32 = arith.constant 0 : i32
    %c0_i32_0 = arith.constant 0 : i32
    return %arg1, %c0_i32 : i32, i32
  }
  func.func @transform_1(%arg0: i32, %arg1: i32) -> (i32, i32) {
    %c0_i32 = arith.constant 0 : i32
    %c0_i32_0 = arith.constant 0 : i32
    return %c0_i32, %arg0 : i32, i32
  }
  func.func @transform_2(%arg0: i32, %arg1: i32) -> (i32, i32) {
    %c0_i32 = arith.constant 0 : i32
    %c0_i32_0 = arith.constant 0 : i32
    return %c0_i32, %arg0 : i32, i32
  }
  func.func @transform_3(%arg0: i32, %arg1: i32) -> (i32, i32) {
    %c0_i32 = arith.constant 0 : i32
    return %arg1, %arg0 : i32, i32
  }
}

</mosaic_0001>

<bundles_post_ra>
// kernel: tpu_custom_call.1
= control target key start
LH: loop header
LB: loop body
LE: loop exit
PB: predicated region body
PF: predicated region fallthrough
CT: control target
= control target key end

     0   :  { %vm34_vm0 = vcmask 523264   ;;  %s321_s0 = inlined_call_operand.vmem [shape: f32[32,64], index: 0, kind: input, shape index: {}]   ;;  %s322_s1 = inlined_call_operand.vmem [shape: f32[64,32], index: 1, kind: input, shape index: {}]   ;;  %s323_s2 = inlined_call_operand.vmem [shape: f32[1,32], index: 2, kind: input, shape index: {}]   ;;  %s324_s3 = inlined_call_operand.hbm [shape: f32[32,32], index: 3, kind: output, shape index: {}]  }
   0x1   :  { %v19_v0 = vld [vmem:[%s322_s1] sm:$0xff]  ;;  %v20_v1 = vld [vmem:[%s322_s1 + $0x8] sm:$0xff]  ;;  %v21_v2 = vld [vmem:[%s322_s1 + $0x10] sm:$0xff] }
   0x2   :  { %v192_v3 = vpack.c.bf16 %v20_v1, %v19_v0  ;;  %v22_v4 = vld [vmem:[%s322_s1 + $0x18] sm:$0xff]  ;;  %v23_v6 = vld [vmem:[%s322_s1 + $0x20] sm:$0xff]  ;;  %v24_v7 = vld [vmem:[%s322_s1 + $0x28] sm:$0xff] }
   0x3   :  { %v196_v5 = vpack.c.bf16 %v22_v4, %v21_v2  ;;  %v15_v8 = vld [vmem:[%s321_s0] sm:$0xff]  ;;  %v17_v9 = vld [vmem:[%s321_s0 + $0x10] sm:$0xff] }
   0x4   :  { %193 = vmatprep.subr.bf16.mxu0 %v192_v3  ;;  %208 = vmatprep.subr.bf16.mxu1 %v192_v3 }
   0x5   :  { %195 = vmatpush3.bf16.msra.mxu0 %v192_v3  ;;  %212 = vmatpush3.bf16.msra.mxu1 %v192_v3 }
   0x6   :  { %8 = vsyncpa [#allocation3], 0  ;;  %197 = vmatprep.subr.bf16.mxu0 %v196_v5  ;;  %209 = vmatprep.subr.bf16.mxu1 %v196_v5  ;;  %v200_v10 = vpack.c.bf16 %v24_v7, %v23_v6  ;;  %v25_v11 = vld [vmem:[%s322_s1 + $0x30] sm:$0xff]  ;;  %v26_v12 = vld [vmem:[%s322_s1 + $0x38] sm:$0xff]  ;;  %s243_s10 = smov [#allocation2]   ;;  %vm132_vm1 = vcmask 261120  }
   0x7   :  { %186 = vmatprep.mubr.msk.f32.mxu0 %vm34_vm0, %v15_v8  ;;  %189 = vmatprep.mubr.msk.f32.mxu1 %vm34_vm0, %v17_v9  ;;  %v204_v13 = vpack.c.bf16 %v26_v12, %v25_v11  ;;  %v16_v14 = vld [vmem:[%s321_s0 + $0x8] sm:$0xff]  ;;  %v18_v15 = vld [vmem:[%s321_s0 + $0x18] sm:$0xff]  ;;  %v153_v16 = vld [vmem:[%s323_s2] ss:$0 sm:$0xff]  ;;  %s142_s11 = sshll.u32 %s243_s10, 4  ;;  %s143_s11 = int_to_ptr.vmem [resolvable:$true] %s142_s11 }
   0x8   :  { %s219_s0 = scalar_lea.vmem %s143_s11, 512  ;;  %p224_p1 = scmp.lt.s32.totalorder %s143_s11, %s143_s11 }
   0x9   :  { %199 = vmatpush3.bf16.msra.mxu0 %v196_v5  ;;  %213 = vmatpush3.bf16.msra.mxu1 %v196_v5  ;;  %p220_p0 = scmp.ne.s32.totalorder %s143_s11, %s219_s0  ;;  %p225_p2 = scmp.lt.s32.totalorder %s219_s0, %s219_s0 }
   0xa   :  { %201 = vmatprep.subr.bf16.mxu0 %v200_v10  ;;  %210 = vmatprep.subr.bf16.mxu1 %v200_v10 }
   0xb   :  { %p226_p3 = por %p225_p2, %p224_p1 }
   0xd   :  { %203 = vmatpush3.bf16.msra.mxu0 %v200_v10  ;;  %214 = vmatpush3.bf16.msra.mxu1 %v200_v10  ;;  %p227_p4 = pnand %p226_p3, %p220_p0 }
   0xe   :  { %205 = vmatprep.subr.bf16.mxu0 %v204_v13  ;;  %211 = vmatprep.subr.bf16.mxu1 %v204_v13 }
  0x11   :  { %207 = vmatpush3.bf16.msra.mxu0 %v204_v13  ;;  %215 = vmatpush3.bf16.msra.mxu1 %v204_v13 }
  0x14   :  { %187 = vmatmul.mubr.msk.f32.vlgmr.msra.gmra.mrb[0].mxu0 %vm34_vm0, %v16_v14  ;;  %190 = vmatmul.mubr.msk.f32.vlgmr.msra.gmra.mrb[0].mxu1 %vm34_vm0, %v18_v15 }
  0xe7   :  { %v188_v17 = vpop.f32.mrb[0].mxu0  ;;  %v191_v18 = vpop.f32.mrb[0].mxu1 }
  0xe8   :  { %v119_v19 = vadd.f32 %v188_v17, %v153_v16  ;;  %v129_v20 = vadd.f32 %v191_v18, %v153_v16  ;;  %v113_v21 = vpop.f32.mrb[1].mxu0  ;;  %v123_v22 = vpop.f32.mrb[1].mxu1 }
  0xe9   :  { %v114_v23 = vadd.f32 %v153_v16, %v113_v21  ;;  %v124_v24 = vadd.f32 %v153_v16, %v123_v22 }
  0xea   :  { %134 = vst.msk [vmem:[#allocation2 + $0x8] sm:$0xff] %vm132_vm1, %v119_v19  ;;  %136 = vst.msk [vmem:[#allocation2 + $0x18] sm:$0xff] %vm132_vm1, %v129_v20 }
  0xeb   :  { %133 = vst.msk [vmem:[#allocation2] sm:$0xff] %vm132_vm1, %v114_v23  ;;  %135 = vst.msk [vmem:[#allocation2 + $0x10] sm:$0xff] %vm132_vm1, %v124_v24 }
  0xec   :  { %230 = shalt.err (!%p227_p4)
}
  0xed   :  { %s231_s13 = scalar_lea.hbm %s324_s3, 512 }
  0xee   :  { %p232_p5 = scmp.ne.s32.totalorder %s324_s3, %s231_s13  ;;  %p235_p6 = scmp.lt.u32.totalorder %s231_s13, %s324_s3 }
  0xf0   :  { %p237_p7 = pnand %p235_p6, %p232_p5 }
  0xf2   :  { %240 = shalt.err (!%p237_p7)
}
  0xf3   :  { %s244_s18 = smov 128   ;;  %s245_s19 = smov 8  }
  0xf4   :  { %148 = dma.vmem_to_hbm [thread:$0]  %s143_s11, 512, %s324_s3, [#allocation3], %s244_s18, %s244_s18, %s245_s19  }
  0xf5   :  { %241 = dma.done.wait [#allocation3], 512  }
  0xf6   :  { %242 = vsyncadd [#allocation3], 4294966784 }
  0xf7   :  { %152 = vsyncpa [#allocation3], 1 }

</bundles_post_ra>
